<compile_context>
chip_gen: v5e
topology: v5e:2x2
jax: 0.10.0
libtpu: 0.0.40
codegen_flags: <defaults>
</compile_context>

<pallas_src>
import functools

import jax
import jax.numpy as jnp
from jax.experimental import pallas as pl
from jax.experimental.pallas import tpu as pltpu


# -----------------------------------------------------------------------------
# Fused layer kernel:  out = act((x @ W) * scale + shift)   [+ row softmax]
# Grid = (N tiles [parallel], K tiles [arbitrary / reduction last]).
# -----------------------------------------------------------------------------
def _dense_kernel(x_ref, w_ref, scale_ref, shift_ref, o_ref, acc_ref,
                  *, activation, softmax):
    k = pl.program_id(1)

    @pl.when(k == 0)
    def _():
        acc_ref[...] = jnp.zeros_like(acc_ref)

    acc_ref[...] += jnp.dot(x_ref[...], w_ref[...],
                            preferred_element_type=jnp.float32)

    @pl.when(k == pl.num_programs(1) - 1)
    def _():
        y = acc_ref[...] * scale_ref[...] + shift_ref[...]
        if activation == "relu":
            y = jnp.maximum(y, 0.0)
        elif activation == "leakyrelu":
            y = jnp.where(y > 0.0, y, 0.2 * y)
        elif activation == "sigmoid":
            y = jax.nn.sigmoid(y)
        elif activation == "tanh":
            y = jnp.tanh(y)
        if softmax:  # nn.Softmax(dim=1): full feature row lives in this block
            y = y - jnp.max(y, axis=-1, keepdims=True)
            e = jnp.exp(y)
            y = e / jnp.sum(e, axis=-1, keepdims=True)
        o_ref[...] = y.astype(o_ref.dtype)


def dense_layer(x, w, scale, shift, *, activation=None, softmax=False,
                tn=512, tk=512):
    """One fused Linear (+folded BN) (+activation) (+softmax) layer.

    x: [M, K] f32, w: [K, N] f32 (already transposed vs. torch's [N, K]),
    scale/shift: [1, N] f32 per-output-feature affine (BN + linear bias).
    """
    m, kdim = x.shape
    kdim_w, n = w.shape
    assert kdim == kdim_w
    tk = min(tk, kdim)
    tn = n if softmax else min(tn, n)      # softmax needs the full output row
    assert kdim % tk == 0 and n % tn == 0, "feature dims must tile evenly"

    kernel = functools.partial(_dense_kernel, activation=activation,
                               softmax=softmax)
    return pl.pallas_call(
        kernel,
        out_shape=jax.ShapeDtypeStruct((m, n), x.dtype),
        grid=(n // tn, kdim // tk),
        in_specs=[
            pl.BlockSpec((m, tk), lambda nb, kb: (0, kb)),    # x
            pl.BlockSpec((tk, tn), lambda nb, kb: (kb, nb)),  # W [K, N]
            pl.BlockSpec((1, tn), lambda nb, kb: (0, nb)),    # BN scale
            pl.BlockSpec((1, tn), lambda nb, kb: (0, nb)),    # BN shift (+bias)
        ],
        out_specs=pl.BlockSpec((m, tn), lambda nb, kb: (0, nb)),
        scratch_shapes=[pltpu.VMEM((m, tn), jnp.float32)],
        compiler_params=pltpu.CompilerParams(
            dimension_semantics=("parallel", "arbitrary")),
    )(x, w, scale, shift)


# -----------------------------------------------------------------------------
# Parameter construction (mirrors torch defaults at module construction time).
# -----------------------------------------------------------------------------
def _init_linear(key, in_dim, out_dim):
    kw, kb = jax.random.split(key)
    bound = 1.0 / (in_dim ** 0.5)                     # torch nn.Linear init
    w = jax.random.uniform(kw, (in_dim, out_dim), jnp.float32, -bound, bound)
    b = jax.random.uniform(kb, (out_dim,), jnp.float32, -bound, bound)
    return w, b


class Autoencoder:
    """JAX/Pallas mirror of the PyTorch Autoencoder module (inference mode)."""

    def __init__(self, encoder_dim=(512, 1024, 1024, 1024, 128),
                 activation="relu", batchnorm=True, *, key):
        if activation not in ("sigmoid", "leakyrelu", "tanh", "relu"):
            raise ValueError("Unknown activation type %s" % activation)
        self._dim = len(encoder_dim) - 1
        self._activation = activation
        self._batchnorm = batchnorm
        eps = 1e-5

        def make_layer(k, in_dim, out_dim, with_bn, act, softmax):
            w, b = _init_linear(k, in_dim, out_dim)
            if with_bn:
                # BatchNorm1d at init (eval mode): gamma=1, beta=0,
                # running_mean=0, running_var=1.
                gamma = jnp.ones((out_dim,), jnp.float32)
                beta = jnp.zeros((out_dim,), jnp.float32)
                mean = jnp.zeros((out_dim,), jnp.float32)
                var = jnp.ones((out_dim,), jnp.float32)
                s = gamma / jnp.sqrt(var + eps)
                scale = s
                shift = (b - mean) * s + beta
            else:
                scale = jnp.ones((out_dim,), jnp.float32)
                shift = b
            return {"w": w,
                    "scale": scale.reshape(1, out_dim),
                    "shift": shift.reshape(1, out_dim),
                    "activation": act, "softmax": softmax}

        keys = jax.random.split(key, 2 * self._dim)
        # Encoder: Linear(+BN+act) x (dim-1), final Linear, then Softmax(dim=1).
        self._enc_layers = []
        for i in range(self._dim):
            last = (i == self._dim - 1)
            self._enc_layers.append(make_layer(
                keys[i], encoder_dim[i], encoder_dim[i + 1],
                with_bn=(batchnorm and not last),
                act=(None if last else activation),
                softmax=last))
        # Decoder: Linear(+BN+act) after every layer (including the last).
        decoder_dim = list(reversed(encoder_dim))
        self._dec_layers = []
        for i in range(self._dim):
            self._dec_layers.append(make_layer(
                keys[self._dim + i], decoder_dim[i], decoder_dim[i + 1],
                with_bn=batchnorm, act=activation, softmax=False))

    def _run(self, layers, x):
        for layer in layers:
            x = dense_layer(x, layer["w"], layer["scale"], layer["shift"],
                            activation=layer["activation"],
                            softmax=layer["softmax"])
        return x

    def encoder(self, x):
        return self._run(self._enc_layers, x)

    def decoder(self, latent):
        return self._run(self._dec_layers, latent)

    def forward(self, x):
        latent = self.encoder(x)
        x_hat = self.decoder(latent)
        return (x_hat, latent)


# Pure-JAX reference (same params) for a correctness check.
def _reference_run(layers, x):
    for layer in layers:
        y = jnp.dot(x, layer["w"], preferred_element_type=jnp.float32)
        y = y * layer["scale"] + layer["shift"]
        act = layer["activation"]
        if act == "relu":
            y = jnp.maximum(y, 0.0)
        elif act == "leakyrelu":
            y = jnp.where(y > 0.0, y, 0.2 * y)
        elif act == "sigmoid":
            y = jax.nn.sigmoid(y)
        elif act == "tanh":
            y = jnp.tanh(y)
        if layer["softmax"]:
            y = jax.nn.softmax(y, axis=1)
        x = y
    return x


if __name__ == "__main__":
    root = jax.random.PRNGKey(0)
    pkey, xkey = jax.random.split(root)

    model = Autoencoder(key=pkey)
    num, feat_dim = 8, 512                    # x: [num, feat_dim]
    x = jax.random.normal(xkey, (num, feat_dim), dtype=jnp.float32)

    x_hat, latent = model.forward(x)
    x_hat, latent = jax.block_until_ready((x_hat, latent))

    assert latent.shape == (num, 128) and latent.dtype == jnp.float32
    assert x_hat.shape == (num, feat_dim) and x_hat.dtype == jnp.float32

    # Numerical check against the pure-JAX reference.
    latent_ref = _reference_run(model._enc_layers, x)
    x_hat_ref = _reference_run(model._dec_layers, latent_ref)
    assert bool(jnp.allclose(latent, latent_ref, rtol=1e-2, atol=1e-2))
    assert bool(jnp.allclose(x_hat, x_hat_ref, rtol=1e-2, atol=1e-2))
    # Encoder output is a softmax: rows must sum to 1.
    assert bool(jnp.allclose(jnp.sum(latent, axis=1), 1.0, atol=1e-3))

    print("KERNEL_OK")
</pallas_src>

<mosaic_0001>
module attributes {stable_mosaic.version = 11 : i64} {
  func.func @_dense_kernel(%arg0: i32, %arg1: i32, %arg2: memref<8x512xf32, #tpu.memory_space<vmem>>, %arg3: memref<512x512xf32, #tpu.memory_space<vmem>>, %arg4: memref<1x512xf32, #tpu.memory_space<vmem>>, %arg5: memref<1x512xf32, #tpu.memory_space<vmem>>, %arg6: memref<8x512xf32, #tpu.memory_space<vmem>>, %arg7: memref<8x512xf32, #tpu.memory_space<vmem>>) attributes {dimension_semantics = [#tpu.dimension_semantics<parallel>, #tpu.dimension_semantics<arbitrary>], iteration_bounds = array<i64: 2, 1>, scalar_prefetch = 0 : i64, scratch_operands = 1 : i64, tpu.core_type = #tpu.core_type<tc>, window_params = [{transform_indices = @transform_0, window_bounds = array<i64: 8, 512>}, {transform_indices = @transform_1, window_bounds = array<i64: 512, 512>}, {transform_indices = @transform_2, window_bounds = array<i64: 1, 512>}, {transform_indices = @transform_3, window_bounds = array<i64: 1, 512>}, {transform_indices = @transform_4, window_bounds = array<i64: 8, 512>}]} {
    %c0_i32 = arith.constant 0 : i32
    %0 = arith.cmpi eq, %arg1, %c0_i32 : i32
    %1 = arith.extui %0 : i1 to i32
    %c0_i32_0 = arith.constant 0 : i32
    %2 = arith.cmpi ne, %1, %c0_i32_0 : i32
    scf.if %2 {
      %cst_10 = arith.constant 0.000000e+00 : f32
      %12 = vector.broadcast %cst_10 : f32 to vector<8x512xf32>
      %c0_11 = arith.constant 0 : index
      %c0_12 = arith.constant 0 : index
      %13 = vector.load %arg7[%c0_11, %c0_12] : memref<8x512xf32, #tpu.memory_space<vmem>>, vector<8x512xf32>
      tpu.vector_store %arg7[%c0_11, %c0_12], %12 {strides = array<i32>} : memref<8x512xf32, #tpu.memory_space<vmem>>, vector<8x512xf32>,
    } else {
    }
    %c0 = arith.constant 0 : index
    %c0_1 = arith.constant 0 : index
    %3 = vector.load %arg7[%c0, %c0_1] : memref<8x512xf32, #tpu.memory_space<vmem>>, vector<8x512xf32>
    %c0_2 = arith.constant 0 : index
    %c0_3 = arith.constant 0 : index
    %4 = vector.load %arg2[%c0_2, %c0_3] : memref<8x512xf32, #tpu.memory_space<vmem>>, vector<8x512xf32>
    %c0_4 = arith.constant 0 : index
    %c0_5 = arith.constant 0 : index
    %5 = vector.load %arg3[%c0_4, %c0_5] : memref<512x512xf32, #tpu.memory_space<vmem>>, vector<512x512xf32>
    %cst = arith.constant dense<0.000000e+00> : vector<8x512xf32>
    %6 = tpu.matmul %4, %5, %cst {dimension_numbers = #tpu.dot_dimension_numbers<[1], [0], [0], [1], [0, 0, 1, 1], [], []>} : vector<8x512xf32>, vector<512x512xf32>, vector<8x512xf32> -> vector<8x512xf32>
    %7 = arith.addf %3, %6 : vector<8x512xf32>
    %c0_6 = arith.constant 0 : index
    %c0_7 = arith.constant 0 : index
    %8 = vector.load %arg7[%c0_6, %c0_7] : memref<8x512xf32, #tpu.memory_space<vmem>>, vector<8x512xf32>
    tpu.vector_store %arg7[%c0_6, %c0_7], %7 {strides = array<i32>} : memref<8x512xf32, #tpu.memory_space<vmem>>, vector<8x512xf32>,
    %c0_i32_8 = arith.constant 0 : i32
    %9 = arith.cmpi eq, %arg1, %c0_i32_8 : i32
    %10 = arith.extui %9 : i1 to i32
    %c0_i32_9 = arith.constant 0 : i32
    %11 = arith.cmpi ne, %10, %c0_i32_9 : i32
    scf.if %11 {
      %c0_10 = arith.constant 0 : index
      %c0_11 = arith.constant 0 : index
      %12 = vector.load %arg7[%c0_10, %c0_11] : memref<8x512xf32, #tpu.memory_space<vmem>>, vector<8x512xf32>
      %c0_12 = arith.constant 0 : index
      %c0_13 = arith.constant 0 : index
      %13 = vector.load %arg4[%c0_12, %c0_13] : memref<1x512xf32, #tpu.memory_space<vmem>>, vector<1x512xf32>
      %14 = vector.broadcast %13 : vector<1x512xf32> to vector<8x512xf32>
      %15 = arith.mulf %12, %14 : vector<8x512xf32>
      %c0_14 = arith.constant 0 : index
      %c0_15 = arith.constant 0 : index
      %16 = vector.load %arg5[%c0_14, %c0_15] : memref<1x512xf32, #tpu.memory_space<vmem>>, vector<1x512xf32>
      %17 = vector.broadcast %16 : vector<1x512xf32> to vector<8x512xf32>
      %18 = arith.addf %15, %17 : vector<8x512xf32>
      %cst_16 = arith.constant 0.000000e+00 : f32
      %19 = vector.broadcast %cst_16 : f32 to vector<8x512xf32>
      %20 = arith.maximumf %18, %19 : vector<8x512xf32>
      %c0_17 = arith.constant 0 : index
      %c0_18 = arith.constant 0 : index
      %21 = vector.load %arg6[%c0_17, %c0_18] : memref<8x512xf32, #tpu.memory_space<vmem>>, vector<8x512xf32>
      tpu.vector_store %arg6[%c0_17, %c0_18], %20 {strides = array<i32>} : memref<8x512xf32, #tpu.memory_space<vmem>>, vector<8x512xf32>,
    } else {
    }
    return
  }
  func.func @transform_0(%arg0: i32, %arg1: i32) -> (i32, i32) {
    %c0_i32 = arith.constant 0 : i32
    %c0_i32_0 = arith.constant 0 : i32
    return %c0_i32, %arg1 : i32, i32
  }
  func.func @transform_1(%arg0: i32, %arg1: i32) -> (i32, i32) {
    %c0_i32 = arith.constant 0 : i32
    return %arg1, %arg0 : i32, i32
  }
  func.func @transform_2(%arg0: i32, %arg1: i32) -> (i32, i32) {
    %c0_i32 = arith.constant 0 : i32
    %c0_i32_0 = arith.constant 0 : i32
    return %c0_i32, %arg0 : i32, i32
  }
  func.func @transform_3(%arg0: i32, %arg1: i32) -> (i32, i32) {
    %c0_i32 = arith.constant 0 : i32
    %c0_i32_0 = arith.constant 0 : i32
    return %c0_i32, %arg0 : i32, i32
  }
  func.func @transform_4(%arg0: i32, %arg1: i32) -> (i32, i32) {
    %c0_i32 = arith.constant 0 : i32
    %c0_i32_0 = arith.constant 0 : i32
    return %c0_i32, %arg0 : i32, i32
  }
}

</mosaic_0001>

<bundles_post_ra>
// kernel: tpu_custom_call.1
= control target key start
LH: loop header
LB: loop body
LE: loop exit
PB: predicated region body
PF: predicated region fallthrough
CT: control target
= control target key end

     0   :  { %s1969_s0 = inlined_call_operand.hbm [shape: f32[8,512], index: 0, kind: input, shape index: {}]   ;;  %s1970_s1 = inlined_call_operand.hbm [shape: f32[512,1024], index: 1, kind: input, shape index: {}]   ;;  %s1971_s2 = inlined_call_operand.hbm [shape: f32[1,1024], index: 2, kind: input, shape index: {}]   ;;  %s1972_s3 = inlined_call_operand.hbm [shape: f32[1,1024], index: 3, kind: input, shape index: {}]   ;;  %s1973_s4 = inlined_call_operand.hbm [shape: f32[8,1024], index: 4, kind: output, shape index: {}]  }
   0x1   :  { %1977 = sst [smem:[#allocation20_spill]] %s1969_s0 }
   0x2   :  { %1978 = sst [smem:[#allocation21_spill]] %s1970_s1 }
   0x3   :  { %9 = vsyncpa [#allocation4], 0 }
   0x4   :  { %10 = vsyncpa [#allocation7], 0 }
   0x5   :  { %12 = vsyncpa [#allocation7 + $0x1], 0 }
   0x6   :  { %13 = vsyncpa [#allocation10], 0 }
   0x7   :  { %15 = vsyncpa [#allocation10 + $0x1], 0 }
   0x8   :  { %16 = vsyncpa [#allocation5], 0 }
   0x9   :  { %18 = vsyncpa [#allocation5 + $0x1], 0  ;;  %s1489_s15 = smov 0   ;;  %s1491_s16 = smov 0  }
   0xa   :  { %s1493_s17 = smov 0   ;;  %s1495_s18 = smov 0  }
   0xb   :  { %s1497_s19 = smov 0   ;;  %s1499_s20 = smov 0  }
   0xc LB: > { %1979 = sst [smem:[#allocation16_spill]] %s1446_s17  ;;  %s36_s21 = sadd.s32 1, %s1454_s19  ;;  %s1458_s20 = sphi %s1499_s20, %s24_s20   ;;  %s1454_s19 = sphi %s1497_s19, %s1994_s19   ;;  %s1450_s18 = sphi %s1495_s18, %s1993_s18   ;;  %s1446_s17 = sphi %s1493_s17, %s1992_s17   ;;  %s1442_s16 = sphi %s1491_s16, %s1996_s16   ;;  %s1438_s15 = sphi %s1489_s15, %s1995_s15  }
   0xd   : > { %1980 = sst [smem:[#allocation17_spill]] %s1454_s19  ;;  %s71_s22 = sadd.s32 1, %s1446_s17 }
   0xe   : > { %p38_p0 = scmp.ge.s32.totalorder %s36_s21, 2  ;;  %p78_p1 = scmp.ne.s32.totalorder %s1446_s17, %s1442_s16 }
   0xf   : > { %p79_p2 = scmp.eq.s32.totalorder %s1458_s20, 0  ;;  %p1141_p3 = scmp.ge.s32.totalorder %s1458_s20, 2 }
  0x10   : > { %s1998_s21 = smov (%p38_p0, %s36_s21), 0  ;;  %p1193_p5 = scmp.lt.s32.totalorder %s1458_s20, 2 }
  0x11   : > { %1981 = sst [smem:[#allocation18_spill]] %s1998_s21  ;;  %p1530_p4 = por %p79_p2, %p78_p1 }
  0x12   : > { %s67_s24 = ssub.s32 %s1454_s19, %s1998_s21  ;;  %s201_s25 = sand.u32 1, %s1458_s20  }
  0x13   : > { %p69_p6 = scmp.eq.s32.totalorder %s67_s24, 0  ;;  %s1539_s26 = sand.u32 1, %s1446_s17  }
  0x14   : > { %s1160_s27 = sshll.u32 %s1454_s19, 5  ;;  %s1142_s29 = sshll.u32 %s1539_s26, 11 }
  0x15   : > { %s1543_s28 = scalar_select %p69_p6, %s1446_s17, %s71_s22  }
  0x16   : > { %s1984_s1 = sld [smem:[#allocation21_spill]]  ;;  %s205_s8 = scalar_lea.vmem [#allocation6], %s1142_s29 }
  0x17   : > { %1983 = sst [smem:[#allocation19_spill]] %s1543_s28  ;;  %s216_s9 = sshll.u32 %s205_s8, 4  ;;  %s217_s9 = int_to_ptr.vmem [resolvable:$true] %s216_s9 }
  0x18   : > { %p1553_p7 = pnand %p1193_p5, %p1530_p4  ;;  %s1557_s11 = scalar_lea.sflag [#allocation7], %s201_s25 }
  0x19   : > { %s1460_s12 = smov 1024   ;;  %s1461_s13 = smov 512  }
  0x1a   : > { %s1462_s14 = smov 32   ;;  %s1563_s22 = sadd.s32 4294967295, %s1458_s20  }
  0x1b   : > { %s1138_s23 = sadd.s32 4294967294, %s1458_s20   ;;  %p84_p8 = scmp.ne.s32.totalorder %s1442_s16, %s1438_s15 }
  0x1c   : > { %s213_s6 = scalar_lea.hbm %s1984_s1, %s1160_s27  ;;  %p85_p9 = scmp.eq.s32.totalorder %s1563_s22, 0 }
  0x1d   : > { %s214_s7 = sshll.u32 %s213_s6, 4  ;;  %p160_p10 = scmp.eq.s32.totalorder %s1563_s22, 1  ;;  %s215_s7 = int_to_ptr.hbm [resolvable:$true] %s214_s7 }
  0x1e   : > { %1181 = dma.hbm_to_vmem [thread:$0]  (!%p1553_p7), %s215_s7, 32768, %s217_s9, %s1557_s11, %s1460_s12, %s1461_s13, %s1462_s14  }
  0x1f   : > { %p166_p11 = scmp.eq.s32.totalorder %s1138_s23, 1  ;;  %p1572_p12 = por %p85_p9, %p84_p8 }
  0x20   : > { %p1139_p13 = scmp.ge.s32.totalorder %s1458_s20, 1  ;;  %p1580_p0 = por %p160_p10, %p78_p1 }
  0x21   : > { %p1584_p2 = por %p166_p11, %p84_p8  ;;  %p173_p4 = scmp.lt.s32.totalorder %s1458_s20, 3 }
  0x22   : > { %s1989_s0 = sld [smem:[#allocation20_spill]]  ;;  %s1463_s7 = smov [#allocation3]  }
  0x23   : > { %p1592_p5 = pnand %p1139_p13, %p173_p4  ;;  %s190_s8 = sshll.u32 %s1463_s7, 4  ;;  %s191_s8 = int_to_ptr.vmem [resolvable:$true] %s190_s8 }
  0x24   : > { %s1145_s9 = sshll.u32 %s1539_s26, 2  ;;  %s1146_s12 = sshll.u32 %s1454_s19, 2 }
  0x25   : > { %p1174_p1 = pneg %p1592_p5  ;;  %s234_s23 = scalar_lea.hbm %s1971_s2, %s1146_s12 }
  0x26   : > { %s236_s29 = sshll.u32 %s234_s23, 4  ;;  %s230_s30 = scalar_lea.vmem [#allocation8], %s1145_s9  ;;  %s237_s29 = int_to_ptr.hbm [resolvable:$true] %s236_s29 }
  0x27   : > { %p1175_p6 = pnand %p1174_p1, %p85_p9  ;;  %s253_s21 = scalar_lea.hbm %s1972_s3, %s1146_s12 }
  0x28   : > { %s188_s5 = sshll.u32 %s1989_s0, 4  ;;  %s238_s0 = sshll.u32 %s230_s30, 4  ;;  %s189_s5 = int_to_ptr.hbm [resolvable:$true] %s188_s5  ;;  %s239_s0 = int_to_ptr.vmem [resolvable:$true] %s238_s0 }
  0x29   : > { %1177 = dma.hbm_to_vmem [thread:$0]  (!%p1175_p6), %s189_s5, 512, %s191_s8, [#allocation4]  }
  0x2a   : > { %1184 = dma.hbm_to_vmem [thread:$0]  (!%p1553_p7), %s237_s29, 64, %s239_s0, %s1557_s11  }
  0x2b   : > { %s255_s19 = sshll.u32 %s253_s21, 4  ;;  %s249_s28 = scalar_lea.vmem [#allocation9], %s1145_s9  ;;  %s256_s19 = int_to_ptr.hbm [resolvable:$true] %s255_s19 }
  0x2c   : > { %s257_s17 = sshll.u32 %s249_s28, 4  ;;  %s246_s13 = scalar_lea.sflag [#allocation10], %s1539_s26  ;;  %s258_s17 = int_to_ptr.vmem [resolvable:$true] %s257_s17 }
  0x2d   : > { %1187 = dma.hbm_to_vmem [thread:$0]  (!%p1553_p7), %s256_s19, 64, %s258_s17, %s246_s13  }
  0x2e   : > { %266 = sbr.rel (%p1592_p5) target bundleno = 367 (0x16f), region = 36 }
  0x33   : > { %1421 = dma.done.wait (%p85_p9), [#allocation4], 512  }
  0x34   : > { %1423 = vsyncadd (%p85_p9), [#allocation4], 4294966784  ;;  %s273_s0 = sand.u32 1, %s1563_s22   ;;  %s1622_s1 = sand.u32 1, %s1442_s16  }
  0x35   : > { %s1151_s21 = sshll.u32 %s1622_s1, 11  ;;  %s274_s26 = scalar_lea.sflag [#allocation7], %s273_s0 }
  0x36   : > { %s1625_s28 = scalar_lea.vmem [#allocation6], %s1151_s21 }
  0x37   : > { %1425 = dma.done.wait (%p1572_p12), %s274_s26, 32832  }
  0x38   : > { %1427 = vsyncadd (%p1572_p12), %s274_s26, 4294934464  ;;  %s1152_s17 = sshll.u32 %s1622_s1, 2  ;;  %s294_s10 = scalar_lea.sflag [#allocation10], %s1622_s1 }
  0x39   : > { %s1632_s19 = scalar_lea.vmem [#allocation8], %s1152_s17  ;;  %s1635_s11 = scalar_lea.vmem [#allocation9], %s1152_s17 }
  0x3a   : > { %1429 = dma.done.wait (%p1572_p12), %s294_s10, 64  }
  0x3b   : > { %1431 = vsyncadd (%p1572_p12), %s294_s10, 4294967232  ;;  %v543_v0 = vld [vmem:[%s1625_s28 + $0x5e0] sm:$0xff]  ;;  %v544_v62 = vld [vmem:[%s1625_s28 + $0x5e8] sm:$0xff]  ;;  %s1154_s22 = sshll.u32 %s1622_s1, 5  ;;  %s1161_s5 = sshll.u32 %s1450_s18, 5 }
  0x3c   : > { %v539_v1 = vld [vmem:[%s1625_s28 + $0x5c0] sm:$0xff]  ;;  %651 = vmatpush.msra.mxu2 %v543_v0  ;;  %v608_v63 = vld [vmem:[%s1625_s28 + $0x7e8] sm:$0xff]  ;;  %s1924_s24 = scalar_lea.vmem [#allocation11], %s1154_s22  ;;  %s994_s9 = scalar_lea.hbm %s1973_s4, %s1161_s5 }
  0x3d   : > { %v607_v2 = vld [vmem:[%s1625_s28 + $0x7e0] sm:$0xff]  ;;  %s996_s12 = sshll.u32 %s1924_s24, 4  ;;  %s998_s14 = sshll.u32 %s994_s9, 4  ;;  %s997_s12 = int_to_ptr.vmem [resolvable:$true] %s996_s12  ;;  %s999_s14 = int_to_ptr.hbm [resolvable:$true] %s998_s14 }
  0x3e   : > { %671 = vmatpush.msra.mxu3 %v607_v2  ;;  %v415_v3 = vld [vmem:[%s1625_s28 + $0x1e0] sm:$0xff]  ;;  %652 = vmatpush.msra.mxu2 %v539_v1  ;;  %v540_v2 = vld [vmem:[%s1625_s28 + $0x5c8] sm:$0xff]  ;;  %s983_s18 = scalar_lea.sflag [#allocation5], %s1622_s1  ;;  %s1382_s23 = sshra.s32 %s999_s14, 4  ;;  %s1383_s23 = int_to_ptr.hbm [resolvable:$true] %s1382_s23 }
  0x3f   : > { %v479_v4 = vld [vmem:[%s1625_s28 + $0x3e0] sm:$0xff]  ;;  %611 = vmatpush.msra.mxu0 %v415_v3  ;;  %v416_v3 = vld [vmem:[%s1625_s28 + $0x1e8] sm:$0xff]  ;;  %s1384_s29 = scalar_lea.hbm %s1383_s23, 32  ;;  %s1388_s13 = scalar_lea.hbm %s1973_s4, 64 }
  0x40   : > { %v535_v5 = vld [vmem:[%s1625_s28 + $0x5a0] sm:$0xff]  ;;  %631 = vmatpush.msra.mxu1 %v479_v4  ;;  %v480_v4 = vld [vmem:[%s1625_s28 + $0x3e8] sm:$0xff]  ;;  %p1385_p7 = scmp.ne.s32.totalorder %s1383_s23, %s1384_s29  ;;  %p1389_p10 = scmp.lt.s32.totalorder %s1383_s23, %s1973_s4 }
  0x41   : > { %v603_v6 = vld [vmem:[%s1625_s28 + $0x7c0] sm:$0xff]  ;;  %653 = vmatpush.msra.mxu2 %v535_v5  ;;  %v604_v5 = vld [vmem:[%s1625_s28 + $0x7c8] sm:$0xff]  ;;  %p1390_p11 = scmp.lt.s32.totalorder %s1388_s13, %s1384_s29 }
  0x42   : > { %v411_v7 = vld [vmem:[%s1625_s28 + $0x1c0] sm:$0xff]  ;;  %672 = vmatpush.msra.mxu3 %v603_v6  ;;  %v536_v6 = vld [vmem:[%s1625_s28 + $0x5a8] sm:$0xff]  ;;  %p1386_p8 = pnand %p1385_p7, %p1580_p0 }
  0x43   : > { %v475_v8 = vld [vmem:[%s1625_s28 + $0x3c0] sm:$0xff]  ;;  %612 = vmatpush.msra.mxu0 %v411_v7  ;;  %v412_v7 = vld [vmem:[%s1625_s28 + $0x1c8] sm:$0xff]  ;;  %p1391_p12 = por %p1390_p11, %p1389_p10 }
  0x44   : > { %v599_v9 = vld [vmem:[%s1625_s28 + $0x7a0] sm:$0xff]  ;;  %632 = vmatpush.msra.mxu1 %v475_v8  ;;  %v476_v8 = vld [vmem:[%s1625_s28 + $0x3c8] sm:$0xff]  ;;  %p1387_p9 = pneg %p1386_p8 }
  0x45   : > { %v407_v10 = vld [vmem:[%s1625_s28 + $0x1a0] sm:$0xff]  ;;  %673 = vmatpush.msra.mxu3 %v599_v9  ;;  %v600_v9 = vld [vmem:[%s1625_s28 + $0x7a8] sm:$0xff] }
  0x46   : > { %v531_v11 = vld [vmem:[%s1625_s28 + $0x580] sm:$0xff]  ;;  %613 = vmatpush.msra.mxu0 %v407_v10  ;;  %v532_v10 = vld [vmem:[%s1625_s28 + $0x588] sm:$0xff]  ;;  %p1392_p13 = pnand %p1391_p12, %p1387_p9 }
  0x47   : > { %v471_v12 = vld [vmem:[%s1625_s28 + $0x3a0] sm:$0xff]  ;;  %654 = vmatpush.msra.mxu2 %v531_v11  ;;  %v408_v11 = vld [vmem:[%s1625_s28 + $0x1a8] sm:$0xff] }
  0x48   : > { %v595_v13 = vld [vmem:[%s1625_s28 + $0x780] sm:$0xff]  ;;  %633 = vmatpush.msra.mxu1 %v471_v12  ;;  %v472_v12 = vld [vmem:[%s1625_s28 + $0x3a8] sm:$0xff] }
  0x49   : > { %v403_v14 = vld [vmem:[%s1625_s28 + $0x180] sm:$0xff]  ;;  %674 = vmatpush.msra.mxu3 %v595_v13  ;;  %v596_v13 = vld [vmem:[%s1625_s28 + $0x788] sm:$0xff] }
  0x4a   : > { %v467_v15 = vld [vmem:[%s1625_s28 + $0x380] sm:$0xff]  ;;  %614 = vmatpush.msra.mxu0 %v403_v14  ;;  %v528_v14 = vld [vmem:[%s1625_s28 + $0x568] sm:$0xff] }
  0x4b   : > { %v527_v16 = vld [vmem:[%s1625_s28 + $0x560] sm:$0xff]  ;;  %634 = vmatpush.msra.mxu1 %v467_v15  ;;  %v404_v15 = vld [vmem:[%s1625_s28 + $0x188] sm:$0xff] }
  0x4c   : > { %v591_v17 = vld [vmem:[%s1625_s28 + $0x760] sm:$0xff]  ;;  %655 = vmatpush.msra.mxu2 %v527_v16  ;;  %v468_v16 = vld [vmem:[%s1625_s28 + $0x388] sm:$0xff] }
  0x4d   : > { %v399_v18 = vld [vmem:[%s1625_s28 + $0x160] sm:$0xff]  ;;  %675 = vmatpush.msra.mxu3 %v591_v17  ;;  %v592_v17 = vld [vmem:[%s1625_s28 + $0x768] sm:$0xff] }
  0x4e   : > { %v463_v19 = vld [vmem:[%s1625_s28 + $0x360] sm:$0xff]  ;;  %615 = vmatpush.msra.mxu0 %v399_v18  ;;  %v524_v18 = vld [vmem:[%s1625_s28 + $0x548] sm:$0xff] }
  0x4f   : > { %v523_v20 = vld [vmem:[%s1625_s28 + $0x540] sm:$0xff]  ;;  %635 = vmatpush.msra.mxu1 %v463_v19  ;;  %v400_v19 = vld [vmem:[%s1625_s28 + $0x168] sm:$0xff] }
  0x50   : > { %v587_v21 = vld [vmem:[%s1625_s28 + $0x740] sm:$0xff]  ;;  %656 = vmatpush.msra.mxu2 %v523_v20  ;;  %v464_v20 = vld [vmem:[%s1625_s28 + $0x368] sm:$0xff] }
  0x51   : > { %v395_v22 = vld [vmem:[%s1625_s28 + $0x140] sm:$0xff]  ;;  %676 = vmatpush.msra.mxu3 %v587_v21  ;;  %v588_v21 = vld [vmem:[%s1625_s28 + $0x748] sm:$0xff] }
  0x52   : > { %v459_v23 = vld [vmem:[%s1625_s28 + $0x340] sm:$0xff]  ;;  %616 = vmatpush.msra.mxu0 %v395_v22  ;;  %v520_v22 = vld [vmem:[%s1625_s28 + $0x528] sm:$0xff] }
  0x53   : > { %v519_v24 = vld [vmem:[%s1625_s28 + $0x520] sm:$0xff]  ;;  %636 = vmatpush.msra.mxu1 %v459_v23  ;;  %v396_v23 = vld [vmem:[%s1625_s28 + $0x148] sm:$0xff] }
  0x54   : > { %v583_v25 = vld [vmem:[%s1625_s28 + $0x720] sm:$0xff]  ;;  %657 = vmatpush.msra.mxu2 %v519_v24  ;;  %v460_v24 = vld [vmem:[%s1625_s28 + $0x348] sm:$0xff] }
  0x55   : > { %v391_v26 = vld [vmem:[%s1625_s28 + $0x120] sm:$0xff]  ;;  %677 = vmatpush.msra.mxu3 %v583_v25  ;;  %v584_v25 = vld [vmem:[%s1625_s28 + $0x728] sm:$0xff] }
  0x56   : > { %v455_v27 = vld [vmem:[%s1625_s28 + $0x320] sm:$0xff]  ;;  %617 = vmatpush.msra.mxu0 %v391_v26  ;;  %v516_v26 = vld [vmem:[%s1625_s28 + $0x508] sm:$0xff] }
  0x57   : > { %v515_v28 = vld [vmem:[%s1625_s28 + $0x500] sm:$0xff]  ;;  %637 = vmatpush.msra.mxu1 %v455_v27  ;;  %v392_v27 = vld [vmem:[%s1625_s28 + $0x128] sm:$0xff] }
  0x58   : > { %v579_v29 = vld [vmem:[%s1625_s28 + $0x700] sm:$0xff]  ;;  %658 = vmatpush.msra.mxu2 %v515_v28  ;;  %v456_v28 = vld [vmem:[%s1625_s28 + $0x328] sm:$0xff] }
  0x59   : > { %v387_v30 = vld [vmem:[%s1625_s28 + $0x100] sm:$0xff]  ;;  %678 = vmatpush.msra.mxu3 %v579_v29  ;;  %v580_v29 = vld [vmem:[%s1625_s28 + $0x708] sm:$0xff] }
  0x5a   : > { %v451_v31 = vld [vmem:[%s1625_s28 + $0x300] sm:$0xff]  ;;  %618 = vmatpush.msra.mxu0 %v387_v30  ;;  %v512_v30 = vld [vmem:[%s1625_s28 + $0x4e8] sm:$0xff] }
  0x5b   : > { %v511_v32 = vld [vmem:[%s1625_s28 + $0x4e0] sm:$0xff]  ;;  %638 = vmatpush.msra.mxu1 %v451_v31  ;;  %v388_v31 = vld [vmem:[%s1625_s28 + $0x108] sm:$0xff] }
  0x5c   : > { %v575_v33 = vld [vmem:[%s1625_s28 + $0x6e0] sm:$0xff]  ;;  %659 = vmatpush.msra.mxu2 %v511_v32  ;;  %v452_v32 = vld [vmem:[%s1625_s28 + $0x308] sm:$0xff] }
  0x5d   : > { %v383_v34 = vld [vmem:[%s1625_s28 + $0xe0] sm:$0xff]  ;;  %679 = vmatpush.msra.mxu3 %v575_v33  ;;  %v576_v33 = vld [vmem:[%s1625_s28 + $0x6e8] sm:$0xff] }
  0x5e   : > { %v447_v35 = vld [vmem:[%s1625_s28 + $0x2e0] sm:$0xff]  ;;  %619 = vmatpush.msra.mxu0 %v383_v34  ;;  %v508_v34 = vld [vmem:[%s1625_s28 + $0x4c8] sm:$0xff] }
  0x5f   : > { %v507_v36 = vld [vmem:[%s1625_s28 + $0x4c0] sm:$0xff]  ;;  %639 = vmatpush.msra.mxu1 %v447_v35  ;;  %v384_v35 = vld [vmem:[%s1625_s28 + $0xe8] sm:$0xff] }
  0x60   : > { %v571_v37 = vld [vmem:[%s1625_s28 + $0x6c0] sm:$0xff]  ;;  %660 = vmatpush.msra.mxu2 %v507_v36  ;;  %v448_v36 = vld [vmem:[%s1625_s28 + $0x2e8] sm:$0xff] }
  0x61   : > { %v379_v38 = vld [vmem:[%s1625_s28 + $0xc0] sm:$0xff]  ;;  %680 = vmatpush.msra.mxu3 %v571_v37  ;;  %v572_v37 = vld [vmem:[%s1625_s28 + $0x6c8] sm:$0xff] }
  0x62   : > { %v443_v39 = vld [vmem:[%s1625_s28 + $0x2c0] sm:$0xff]  ;;  %620 = vmatpush.msra.mxu0 %v379_v38  ;;  %v504_v38 = vld [vmem:[%s1625_s28 + $0x4a8] sm:$0xff] }
  0x63   : > { %v503_v40 = vld [vmem:[%s1625_s28 + $0x4a0] sm:$0xff]  ;;  %640 = vmatpush.msra.mxu1 %v443_v39  ;;  %v380_v39 = vld [vmem:[%s1625_s28 + $0xc8] sm:$0xff] }
  0x64   : > { %v567_v41 = vld [vmem:[%s1625_s28 + $0x6a0] sm:$0xff]  ;;  %661 = vmatpush.msra.mxu2 %v503_v40  ;;  %v444_v40 = vld [vmem:[%s1625_s28 + $0x2c8] sm:$0xff] }
  0x65   : > { %v375_v42 = vld [vmem:[%s1625_s28 + $0xa0] sm:$0xff]  ;;  %681 = vmatpush.msra.mxu3 %v567_v41  ;;  %v568_v41 = vld [vmem:[%s1625_s28 + $0x6a8] sm:$0xff] }
  0x66   : > { %v439_v43 = vld [vmem:[%s1625_s28 + $0x2a0] sm:$0xff]  ;;  %621 = vmatpush.msra.mxu0 %v375_v42  ;;  %v500_v42 = vld [vmem:[%s1625_s28 + $0x488] sm:$0xff] }
  0x67   : > { %v499_v44 = vld [vmem:[%s1625_s28 + $0x480] sm:$0xff]  ;;  %641 = vmatpush.msra.mxu1 %v439_v43  ;;  %v376_v43 = vld [vmem:[%s1625_s28 + $0xa8] sm:$0xff] }
  0x68   : > { %v563_v45 = vld [vmem:[%s1625_s28 + $0x680] sm:$0xff]  ;;  %662 = vmatpush.msra.mxu2 %v499_v44  ;;  %v440_v44 = vld [vmem:[%s1625_s28 + $0x2a8] sm:$0xff] }
  0x69   : > { %v371_v46 = vld [vmem:[%s1625_s28 + $0x80] sm:$0xff]  ;;  %682 = vmatpush.msra.mxu3 %v563_v45  ;;  %v564_v45 = vld [vmem:[%s1625_s28 + $0x688] sm:$0xff] }
  0x6a   : > { %v435_v47 = vld [vmem:[%s1625_s28 + $0x280] sm:$0xff]  ;;  %622 = vmatpush.msra.mxu0 %v371_v46  ;;  %v496_v46 = vld [vmem:[%s1625_s28 + $0x468] sm:$0xff] }
  0x6b   : > { %v495_v48 = vld [vmem:[%s1625_s28 + $0x460] sm:$0xff]  ;;  %642 = vmatpush.msra.mxu1 %v435_v47  ;;  %v372_v47 = vld [vmem:[%s1625_s28 + $0x88] sm:$0xff] }
  0x6c   : > { %v559_v49 = vld [vmem:[%s1625_s28 + $0x660] sm:$0xff]  ;;  %663 = vmatpush.msra.mxu2 %v495_v48  ;;  %v436_v48 = vld [vmem:[%s1625_s28 + $0x288] sm:$0xff] }
  0x6d   : > { %v367_v50 = vld [vmem:[%s1625_s28 + $0x60] sm:$0xff]  ;;  %683 = vmatpush.msra.mxu3 %v559_v49  ;;  %v560_v49 = vld [vmem:[%s1625_s28 + $0x668] sm:$0xff] }
  0x6e   : > { %v431_v51 = vld [vmem:[%s1625_s28 + $0x260] sm:$0xff]  ;;  %623 = vmatpush.msra.mxu0 %v367_v50  ;;  %v492_v50 = vld [vmem:[%s1625_s28 + $0x448] sm:$0xff] }
  0x6f   : > { %v491_v52 = vld [vmem:[%s1625_s28 + $0x440] sm:$0xff]  ;;  %643 = vmatpush.msra.mxu1 %v431_v51  ;;  %v368_v51 = vld [vmem:[%s1625_s28 + $0x68] sm:$0xff] }
  0x70   : > { %v555_v53 = vld [vmem:[%s1625_s28 + $0x640] sm:$0xff]  ;;  %664 = vmatpush.msra.mxu2 %v491_v52  ;;  %v432_v52 = vld [vmem:[%s1625_s28 + $0x268] sm:$0xff] }
  0x71   : > { %v363_v54 = vld [vmem:[%s1625_s28 + $0x40] sm:$0xff]  ;;  %684 = vmatpush.msra.mxu3 %v555_v53  ;;  %v556_v53 = vld [vmem:[%s1625_s28 + $0x648] sm:$0xff] }
  0x72   : > { %v427_v55 = vld [vmem:[%s1625_s28 + $0x240] sm:$0xff]  ;;  %624 = vmatpush.msra.mxu0 %v363_v54  ;;  %v488_v54 = vld [vmem:[%s1625_s28 + $0x428] sm:$0xff] }
  0x73   : > { %v487_v56 = vld [vmem:[%s1625_s28 + $0x420] sm:$0xff]  ;;  %644 = vmatpush.msra.mxu1 %v427_v55  ;;  %v364_v55 = vld [vmem:[%s1625_s28 + $0x48] sm:$0xff] }
  0x74   : > { %v551_v57 = vld [vmem:[%s1625_s28 + $0x620] sm:$0xff]  ;;  %665 = vmatpush.msra.mxu2 %v487_v56  ;;  %v428_v56 = vld [vmem:[%s1625_s28 + $0x248] sm:$0xff] }
  0x75   : > { %v359_v58 = vld [vmem:[%s1625_s28 + $0x20] sm:$0xff]  ;;  %685 = vmatpush.msra.mxu3 %v551_v57  ;;  %v552_v57 = vld [vmem:[%s1625_s28 + $0x628] sm:$0xff] }
  0x76   : > { %v423_v59 = vld [vmem:[%s1625_s28 + $0x220] sm:$0xff]  ;;  %625 = vmatpush.msra.mxu0 %v359_v58  ;;  %v484_v58 = vld [vmem:[%s1625_s28 + $0x408] sm:$0xff] }
  0x77   : > { %v483_v60 = vld [vmem:[%s1625_s28 + $0x400] sm:$0xff]  ;;  %645 = vmatpush.msra.mxu1 %v423_v59  ;;  %v360_v59 = vld [vmem:[%s1625_s28 + $0x28] sm:$0xff] }
  0x78   : > { %v547_v61 = vld [vmem:[%s1625_s28 + $0x600] sm:$0xff]  ;;  %666 = vmatpush.msra.mxu2 %v483_v60  ;;  %v1765_v60 = vld [vmem:[#allocation3 + $0x10] sm:$0xff] }
  0x79   : > { %v355_v0 = vld [vmem:[%s1625_s28] sm:$0xff]  ;;  %686 = vmatpush.msra.mxu3 %v547_v61  ;;  %v424_v61 = vld [vmem:[%s1625_s28 + $0x228] sm:$0xff]  ;;  %667 = vmatmul.f32.vlgmr.msra.gmra.mxu2 %v1765_v60 }
  0x7a   : > { %v419_v1 = vld [vmem:[%s1625_s28 + $0x200] sm:$0xff]  ;;  %731 = vmatpush.msrb.mxu2 %v544_v62  ;;  %626 = vmatpush.msra.mxu0 %v355_v0  ;;  %v545_v62 = vld [vmem:[%s1625_s28 + $0x5f0] sm:$0xff]  ;;  %v1770_v0 = vld [vmem:[#allocation3 + $0x18] sm:$0xff] }
  0x7b   : > { %751 = vmatpush.msrb.mxu3 %v608_v63  ;;  %646 = vmatpush.msra.mxu1 %v419_v1  ;;  %v548_v63 = vld [vmem:[%s1625_s28 + $0x608] sm:$0xff] }
  0x7c   : > { %732 = vmatpush.msrb.mxu2 %v540_v2  ;;  %691 = vmatpush.msrb.mxu0 %v416_v3  ;;  %v356_v1 = vld [vmem:[%s1625_s28 + $0x8] sm:$0xff]  ;;  %v541_v2 = vld [vmem:[%s1625_s28 + $0x5d0] sm:$0xff] }
  0x7d   : > { %711 = vmatpush.msrb.mxu1 %v480_v4  ;;  %752 = vmatpush.msrb.mxu3 %v604_v5  ;;  %v609_v3 = vld [vmem:[%s1625_s28 + $0x7f0] sm:$0xff]  ;;  %v420_v4 = vld [vmem:[%s1625_s28 + $0x208] sm:$0xff]  ;;  %v1777_v5 = vld [vmem:[#allocation3] sm:$0xff] }
  0x7e   : > { %733 = vmatpush.msrb.mxu2 %v536_v6  ;;  %692 = vmatpush.msrb.mxu0 %v412_v7  ;;  %v1780_v6 = vld [vmem:[#allocation3 + $0x8] sm:$0xff]  ;;  %v417_v7 = vld [vmem:[%s1625_s28 + $0x1f0] sm:$0xff] }
  0x7f   : > { %712 = vmatpush.msrb.mxu1 %v476_v8  ;;  %753 = vmatpush.msrb.mxu3 %v600_v9  ;;  %v481_v8 = vld [vmem:[%s1625_s28 + $0x3f0] sm:$0xff] }
  0x80   : > { %734 = vmatpush.msrb.mxu2 %v532_v10  ;;  %693 = vmatpush.msrb.mxu0 %v408_v11  ;;  %v537_v9 = vld [vmem:[%s1625_s28 + $0x5b0] sm:$0xff] }
  0x81   : > { %713 = vmatpush.msrb.mxu1 %v472_v12  ;;  %754 = vmatpush.msrb.mxu3 %v596_v13  ;;  %v605_v10 = vld [vmem:[%s1625_s28 + $0x7d0] sm:$0xff] }
  0x82   : > { %735 = vmatpush.msrb.mxu2 %v528_v14  ;;  %694 = vmatpush.msrb.mxu0 %v404_v15  ;;  %v413_v11 = vld [vmem:[%s1625_s28 + $0x1d0] sm:$0xff] }
  0x83   : > { %714 = vmatpush.msrb.mxu1 %v468_v16  ;;  %755 = vmatpush.msrb.mxu3 %v592_v17  ;;  %v477_v12 = vld [vmem:[%s1625_s28 + $0x3d0] sm:$0xff] }
  0x84   : > { %736 = vmatpush.msrb.mxu2 %v524_v18  ;;  %695 = vmatpush.msrb.mxu0 %v400_v19  ;;  %v533_v13 = vld [vmem:[%s1625_s28 + $0x590] sm:$0xff] }
  0x85   : > { %715 = vmatpush.msrb.mxu1 %v464_v20  ;;  %756 = vmatpush.msrb.mxu3 %v588_v21  ;;  %v601_v14 = vld [vmem:[%s1625_s28 + $0x7b0] sm:$0xff] }
  0x86   : > { %737 = vmatpush.msrb.mxu2 %v520_v22  ;;  %696 = vmatpush.msrb.mxu0 %v396_v23  ;;  %v409_v15 = vld [vmem:[%s1625_s28 + $0x1b0] sm:$0xff] }
  0x87   : > { %716 = vmatpush.msrb.mxu1 %v460_v24  ;;  %757 = vmatpush.msrb.mxu3 %v584_v25  ;;  %v473_v16 = vld [vmem:[%s1625_s28 + $0x3b0] sm:$0xff] }
  0x88   : > { %738 = vmatpush.msrb.mxu2 %v516_v26  ;;  %697 = vmatpush.msrb.mxu0 %v392_v27  ;;  %v529_v17 = vld [vmem:[%s1625_s28 + $0x570] sm:$0xff] }
  0x89   : > { %717 = vmatpush.msrb.mxu1 %v456_v28  ;;  %758 = vmatpush.msrb.mxu3 %v580_v29  ;;  %v597_v18 = vld [vmem:[%s1625_s28 + $0x790] sm:$0xff] }
  0x8a   : > { %739 = vmatpush.msrb.mxu2 %v512_v30  ;;  %698 = vmatpush.msrb.mxu0 %v388_v31  ;;  %v405_v19 = vld [vmem:[%s1625_s28 + $0x190] sm:$0xff] }
  0x8b   : > { %718 = vmatpush.msrb.mxu1 %v452_v32  ;;  %759 = vmatpush.msrb.mxu3 %v576_v33  ;;  %v469_v20 = vld [vmem:[%s1625_s28 + $0x390] sm:$0xff] }
  0x8c   : > { %740 = vmatpush.msrb.mxu2 %v508_v34  ;;  %699 = vmatpush.msrb.mxu0 %v384_v35  ;;  %v525_v21 = vld [vmem:[%s1625_s28 + $0x550] sm:$0xff] }
  0x8d   : > { %719 = vmatpush.msrb.mxu1 %v448_v36  ;;  %760 = vmatpush.msrb.mxu3 %v572_v37  ;;  %v593_v22 = vld [vmem:[%s1625_s28 + $0x770] sm:$0xff] }
  0x8e   : > { %741 = vmatpush.msrb.mxu2 %v504_v38  ;;  %700 = vmatpush.msrb.mxu0 %v380_v39  ;;  %v401_v23 = vld [vmem:[%s1625_s28 + $0x170] sm:$0xff] }
  0x8f   : > { %720 = vmatpush.msrb.mxu1 %v444_v40  ;;  %761 = vmatpush.msrb.mxu3 %v568_v41  ;;  %v465_v24 = vld [vmem:[%s1625_s28 + $0x370] sm:$0xff] }
  0x90   : > { %742 = vmatpush.msrb.mxu2 %v500_v42  ;;  %701 = vmatpush.msrb.mxu0 %v376_v43  ;;  %v521_v25 = vld [vmem:[%s1625_s28 + $0x530] sm:$0xff] }
  0x91   : > { %721 = vmatpush.msrb.mxu1 %v440_v44  ;;  %762 = vmatpush.msrb.mxu3 %v564_v45  ;;  %v589_v26 = vld [vmem:[%s1625_s28 + $0x750] sm:$0xff] }
  0x92   : > { %743 = vmatpush.msrb.mxu2 %v496_v46  ;;  %702 = vmatpush.msrb.mxu0 %v372_v47  ;;  %v397_v27 = vld [vmem:[%s1625_s28 + $0x150] sm:$0xff] }
  0x93   : > { %722 = vmatpush.msrb.mxu1 %v436_v48  ;;  %763 = vmatpush.msrb.mxu3 %v560_v49  ;;  %v461_v28 = vld [vmem:[%s1625_s28 + $0x350] sm:$0xff] }
  0x94   : > { %744 = vmatpush.msrb.mxu2 %v492_v50  ;;  %703 = vmatpush.msrb.mxu0 %v368_v51  ;;  %v517_v29 = vld [vmem:[%s1625_s28 + $0x510] sm:$0xff] }
  0x95   : > { %723 = vmatpush.msrb.mxu1 %v432_v52  ;;  %764 = vmatpush.msrb.mxu3 %v556_v53  ;;  %v585_v30 = vld [vmem:[%s1625_s28 + $0x730] sm:$0xff] }
  0x96   : > { %745 = vmatpush.msrb.mxu2 %v488_v54  ;;  %704 = vmatpush.msrb.mxu0 %v364_v55  ;;  %v393_v31 = vld [vmem:[%s1625_s28 + $0x130] sm:$0xff] }
  0x97   : > { %724 = vmatpush.msrb.mxu1 %v428_v56  ;;  %765 = vmatpush.msrb.mxu3 %v552_v57  ;;  %v457_v32 = vld [vmem:[%s1625_s28 + $0x330] sm:$0xff] }
  0x98   : > { %746 = vmatpush.msrb.mxu2 %v484_v58  ;;  %705 = vmatpush.msrb.mxu0 %v360_v59  ;;  %v513_v33 = vld [vmem:[%s1625_s28 + $0x4f0] sm:$0xff] }
  0x99   : > { %725 = vmatpush.msrb.mxu1 %v424_v61  ;;  %766 = vmatpush.msrb.mxu3 %v548_v63  ;;  %v581_v34 = vld [vmem:[%s1625_s28 + $0x710] sm:$0xff] }
  0x9a   : > { %811 = vmatpush.msra.mxu2 %v545_v62  ;;  %687 = vmatmul.f32.vlgmr.msra.gmra.mxu3 %v1770_v0  ;;  %v389_v35 = vld [vmem:[%s1625_s28 + $0x110] sm:$0xff] }
  0x9b   : > { %706 = vmatpush.msrb.mxu0 %v356_v1  ;;  %831 = vmatpush.msra.mxu3 %v609_v3  ;;  %v453_v36 = vld [vmem:[%s1625_s28 + $0x310] sm:$0xff]  ;;  %v546_v1 = vld [vmem:[%s1625_s28 + $0x5f8] sm:$0xff] }
  0x9c   : > { %812 = vmatpush.msra.mxu2 %v541_v2  ;;  %726 = vmatpush.msrb.mxu1 %v420_v4  ;;  %v509_v37 = vld [vmem:[%s1625_s28 + $0x4d0] sm:$0xff] }
  0x9d   : > { %627 = vmatmul.f32.vlgmr.msra.gmra.mxu0 %v1777_v5  ;;  %647 = vmatmul.f32.vlgmr.msra.gmra.mxu1 %v1780_v6  ;;  %v577_v38 = vld [vmem:[%s1625_s28 + $0x6f0] sm:$0xff] }
  0x9e   : > { %771 = vmatpush.msra.mxu0 %v417_v7  ;;  %791 = vmatpush.msra.mxu1 %v481_v8  ;;  %v385_v39 = vld [vmem:[%s1625_s28 + $0xf0] sm:$0xff]  ;;  %v542_v7 = vld [vmem:[%s1625_s28 + $0x5d8] sm:$0xff] }
  0x9f   : > { %813 = vmatpush.msra.mxu2 %v537_v9  ;;  %832 = vmatpush.msra.mxu3 %v605_v10  ;;  %v449_v40 = vld [vmem:[%s1625_s28 + $0x2f0] sm:$0xff]  ;;  %v610_v8 = vld [vmem:[%s1625_s28 + $0x7f8] sm:$0xff] }
  0xa0   : > { %772 = vmatpush.msra.mxu0 %v413_v11  ;;  %792 = vmatpush.msra.mxu1 %v477_v12  ;;  %v505_v41 = vld [vmem:[%s1625_s28 + $0x4b0] sm:$0xff]  ;;  %v418_v11 = vld [vmem:[%s1625_s28 + $0x1f8] sm:$0xff] }
  0xa1   : > { %814 = vmatpush.msra.mxu2 %v533_v13  ;;  %833 = vmatpush.msra.mxu3 %v601_v14  ;;  %v573_v42 = vld [vmem:[%s1625_s28 + $0x6d0] sm:$0xff]  ;;  %v482_v12 = vld [vmem:[%s1625_s28 + $0x3f8] sm:$0xff] }
  0xa2   : > { %773 = vmatpush.msra.mxu0 %v409_v15  ;;  %793 = vmatpush.msra.mxu1 %v473_v16  ;;  %v381_v43 = vld [vmem:[%s1625_s28 + $0xd0] sm:$0xff]  ;;  %v538_v13 = vld [vmem:[%s1625_s28 + $0x5b8] sm:$0xff] }
  0xa3   : > { %815 = vmatpush.msra.mxu2 %v529_v17  ;;  %834 = vmatpush.msra.mxu3 %v597_v18  ;;  %v445_v44 = vld [vmem:[%s1625_s28 + $0x2d0] sm:$0xff]  ;;  %v606_v14 = vld [vmem:[%s1625_s28 + $0x7d8] sm:$0xff] }
  0xa4   : > { %774 = vmatpush.msra.mxu0 %v405_v19  ;;  %794 = vmatpush.msra.mxu1 %v469_v20  ;;  %v501_v45 = vld [vmem:[%s1625_s28 + $0x490] sm:$0xff]  ;;  %v414_v15 = vld [vmem:[%s1625_s28 + $0x1d8] sm:$0xff] }
  0xa5   : > { %816 = vmatpush.msra.mxu2 %v525_v21  ;;  %835 = vmatpush.msra.mxu3 %v593_v22  ;;  %v569_v46 = vld [vmem:[%s1625_s28 + $0x6b0] sm:$0xff]  ;;  %v478_v16 = vld [vmem:[%s1625_s28 + $0x3d8] sm:$0xff] }
  0xa6   : > { %775 = vmatpush.msra.mxu0 %v401_v23  ;;  %795 = vmatpush.msra.mxu1 %v465_v24  ;;  %v377_v47 = vld [vmem:[%s1625_s28 + $0xb0] sm:$0xff]  ;;  %v534_v17 = vld [vmem:[%s1625_s28 + $0x598] sm:$0xff] }
  0xa7   : > { %817 = vmatpush.msra.mxu2 %v521_v25  ;;  %836 = vmatpush.msra.mxu3 %v589_v26  ;;  %v441_v48 = vld [vmem:[%s1625_s28 + $0x2b0] sm:$0xff]  ;;  %v602_v18 = vld [vmem:[%s1625_s28 + $0x7b8] sm:$0xff] }
  0xa8   : > { %776 = vmatpush.msra.mxu0 %v397_v27  ;;  %796 = vmatpush.msra.mxu1 %v461_v28  ;;  %v497_v49 = vld [vmem:[%s1625_s28 + $0x470] sm:$0xff]  ;;  %v410_v19 = vld [vmem:[%s1625_s28 + $0x1b8] sm:$0xff] }
  0xa9   : > { %818 = vmatpush.msra.mxu2 %v517_v29  ;;  %837 = vmatpush.msra.mxu3 %v585_v30  ;;  %v565_v50 = vld [vmem:[%s1625_s28 + $0x690] sm:$0xff]  ;;  %v474_v20 = vld [vmem:[%s1625_s28 + $0x3b8] sm:$0xff] }
  0xaa   : > { %777 = vmatpush.msra.mxu0 %v393_v31  ;;  %797 = vmatpush.msra.mxu1 %v457_v32  ;;  %v373_v51 = vld [vmem:[%s1625_s28 + $0x90] sm:$0xff]  ;;  %v530_v21 = vld [vmem:[%s1625_s28 + $0x578] sm:$0xff] }
  0xab   : > { %819 = vmatpush.msra.mxu2 %v513_v33  ;;  %838 = vmatpush.msra.mxu3 %v581_v34  ;;  %v437_v52 = vld [vmem:[%s1625_s28 + $0x290] sm:$0xff]  ;;  %v598_v22 = vld [vmem:[%s1625_s28 + $0x798] sm:$0xff] }
  0xac   : > { %778 = vmatpush.msra.mxu0 %v389_v35  ;;  %798 = vmatpush.msra.mxu1 %v453_v36  ;;  %v493_v53 = vld [vmem:[%s1625_s28 + $0x450] sm:$0xff]  ;;  %v406_v23 = vld [vmem:[%s1625_s28 + $0x198] sm:$0xff] }
  0xad   : > { %820 = vmatpush.msra.mxu2 %v509_v37  ;;  %839 = vmatpush.msra.mxu3 %v577_v38  ;;  %v561_v54 = vld [vmem:[%s1625_s28 + $0x670] sm:$0xff]  ;;  %v470_v24 = vld [vmem:[%s1625_s28 + $0x398] sm:$0xff] }
  0xae   : > { %779 = vmatpush.msra.mxu0 %v385_v39  ;;  %799 = vmatpush.msra.mxu1 %v449_v40  ;;  %v369_v55 = vld [vmem:[%s1625_s28 + $0x70] sm:$0xff]  ;;  %v526_v25 = vld [vmem:[%s1625_s28 + $0x558] sm:$0xff] }
  0xaf   : > { %821 = vmatpush.msra.mxu2 %v505_v41  ;;  %840 = vmatpush.msra.mxu3 %v573_v42  ;;  %v433_v56 = vld [vmem:[%s1625_s28 + $0x270] sm:$0xff]  ;;  %v594_v26 = vld [vmem:[%s1625_s28 + $0x778] sm:$0xff] }
  0xb0   : > { %780 = vmatpush.msra.mxu0 %v381_v43  ;;  %800 = vmatpush.msra.mxu1 %v445_v44  ;;  %v489_v57 = vld [vmem:[%s1625_s28 + $0x430] sm:$0xff]  ;;  %v402_v27 = vld [vmem:[%s1625_s28 + $0x178] sm:$0xff] }
  0xb1   : > { %822 = vmatpush.msra.mxu2 %v501_v45  ;;  %841 = vmatpush.msra.mxu3 %v569_v46  ;;  %v557_v58 = vld [vmem:[%s1625_s28 + $0x650] sm:$0xff]  ;;  %v466_v28 = vld [vmem:[%s1625_s28 + $0x378] sm:$0xff] }
  0xb2   : > { %781 = vmatpush.msra.mxu0 %v377_v47  ;;  %801 = vmatpush.msra.mxu1 %v441_v48  ;;  %v365_v59 = vld [vmem:[%s1625_s28 + $0x50] sm:$0xff]  ;;  %v522_v29 = vld [vmem:[%s1625_s28 + $0x538] sm:$0xff] }
  0xb3   : > { %823 = vmatpush.msra.mxu2 %v497_v49  ;;  %842 = vmatpush.msra.mxu3 %v565_v50  ;;  %v429_v61 = vld [vmem:[%s1625_s28 + $0x250] sm:$0xff]  ;;  %v590_v30 = vld [vmem:[%s1625_s28 + $0x758] sm:$0xff] }
  0xb4   : > { %782 = vmatpush.msra.mxu0 %v373_v51  ;;  %802 = vmatpush.msra.mxu1 %v437_v52  ;;  %v485_v62 = vld [vmem:[%s1625_s28 + $0x410] sm:$0xff]  ;;  %v398_v31 = vld [vmem:[%s1625_s28 + $0x158] sm:$0xff] }
  0xb5   : > { %824 = vmatpush.msra.mxu2 %v493_v53  ;;  %843 = vmatpush.msra.mxu3 %v561_v54  ;;  %v553_v63 = vld [vmem:[%s1625_s28 + $0x630] sm:$0xff]  ;;  %v462_v32 = vld [vmem:[%s1625_s28 + $0x358] sm:$0xff] }
  0xb6   : > { %783 = vmatpush.msra.mxu0 %v369_v55  ;;  %803 = vmatpush.msra.mxu1 %v433_v56  ;;  %v361_v2 = vld [vmem:[%s1625_s28 + $0x30] sm:$0xff]  ;;  %v518_v33 = vld [vmem:[%s1625_s28 + $0x518] sm:$0xff] }
  0xb7   : > { %825 = vmatpush.msra.mxu2 %v489_v57  ;;  %844 = vmatpush.msra.mxu3 %v557_v58  ;;  %v425_v3 = vld [vmem:[%s1625_s28 + $0x230] sm:$0xff]  ;;  %v586_v34 = vld [vmem:[%s1625_s28 + $0x738] sm:$0xff] }
  0xb8   : > { %784 = vmatpush.msra.mxu0 %v365_v59  ;;  %804 = vmatpush.msra.mxu1 %v429_v61  ;;  %v549_v4 = vld [vmem:[%s1625_s28 + $0x610] sm:$0xff]  ;;  %v394_v35 = vld [vmem:[%s1625_s28 + $0x138] sm:$0xff] }
  0xb9   : > { %826 = vmatpush.msra.mxu2 %v485_v62  ;;  %845 = vmatpush.msra.mxu3 %v553_v63  ;;  %v357_v9 = vld [vmem:[%s1625_s28 + $0x10] sm:$0xff]  ;;  %v458_v36 = vld [vmem:[%s1625_s28 + $0x338] sm:$0xff] }
  0xba   : > { %747 = vmatmul.f32.vlgmr.msrb.gmra.mxu2 %v1765_v60  ;;  %785 = vmatpush.msra.mxu0 %v361_v2  ;;  %v421_v10 = vld [vmem:[%s1625_s28 + $0x210] sm:$0xff]  ;;  %v514_v37 = vld [vmem:[%s1625_s28 + $0x4f8] sm:$0xff] }
  0xbb   : > { %891 = vmatpush.msrb.mxu2 %v546_v1  ;;  %805 = vmatpush.msra.mxu1 %v425_v3  ;;  %v582_v38 = vld [vmem:[%s1625_s28 + $0x718] sm:$0xff] }
  0xbc   : > { %846 = vmatpush.msra.mxu3 %v549_v4  ;;  %786 = vmatpush.msra.mxu0 %v357_v9  ;;  %v390_v39 = vld [vmem:[%s1625_s28 + $0x118] sm:$0xff] }
  0xbd   : > { %767 = vmatmul.f32.vlgmr.msrb.gmra.mxu3 %v1770_v0  ;;  %892 = vmatpush.msrb.mxu2 %v542_v7  ;;  %v454_v40 = vld [vmem:[%s1625_s28 + $0x318] sm:$0xff] }
  0xbe   : > { %911 = vmatpush.msrb.mxu3 %v610_v8  ;;  %806 = vmatpush.msra.mxu1 %v421_v10  ;;  %v510_v41 = vld [vmem:[%s1625_s28 + $0x4d8] sm:$0xff] }
  0xbf   : > { %707 = vmatmul.f32.vlgmr.msrb.gmra.mxu0 %v1777_v5  ;;  %727 = vmatmul.f32.vlgmr.msrb.gmra.mxu1 %v1780_v6  ;;  %v578_v42 = vld [vmem:[%s1625_s28 + $0x6f8] sm:$0xff] }
  0xc0   : > { %851 = vmatpush.msrb.mxu0 %v418_v11  ;;  %871 = vmatpush.msrb.mxu1 %v482_v12  ;;  %v386_v43 = vld [vmem:[%s1625_s28 + $0xf8] sm:$0xff] }
  0xc1   : > { %893 = vmatpush.msrb.mxu2 %v538_v13  ;;  %912 = vmatpush.msrb.mxu3 %v606_v14  ;;  %v450_v44 = vld [vmem:[%s1625_s28 + $0x2f8] sm:$0xff]  ;;  %v946_v14 = vld [vmem:[%s1632_s19] sm:$0xf] }
  0xc2   : > { %852 = vmatpush.msrb.mxu0 %v414_v15  ;;  %872 = vmatpush.msrb.mxu1 %v478_v16  ;;  %v506_v45 = vld [vmem:[%s1625_s28 + $0x4b8] sm:$0xff]  ;;  %v960_v16 = vld [vmem:[%s1635_s11] sm:$0xf] }
  0xc3   : > { %894 = vmatpush.msrb.mxu2 %v534_v17  ;;  %913 = vmatpush.msrb.mxu3 %v602_v18  ;;  %v574_v46 = vld [vmem:[%s1625_s28 + $0x6d8] sm:$0xff] }
  0xc4   : > { %853 = vmatpush.msrb.mxu0 %v410_v19  ;;  %873 = vmatpush.msrb.mxu1 %v474_v20  ;;  %v382_v47 = vld [vmem:[%s1625_s28 + $0xd8] sm:$0xff]  ;;  %v948_v19 = vperm.slane %v946_v14, 0 }
  0xc5   : > { %895 = vmatpush.msrb.mxu2 %v530_v21  ;;  %914 = vmatpush.msrb.mxu3 %v598_v22  ;;  %v446_v48 = vld [vmem:[%s1625_s28 + $0x2d8] sm:$0xff]  ;;  %v962_v21 = vperm.slane %v960_v16, 0 }
  0xc6   : > { %854 = vmatpush.msrb.mxu0 %v406_v23  ;;  %874 = vmatpush.msrb.mxu1 %v470_v24  ;;  %v502_v49 = vld [vmem:[%s1625_s28 + $0x498] sm:$0xff] }
  0xc7   : > { %896 = vmatpush.msrb.mxu2 %v526_v25  ;;  %915 = vmatpush.msrb.mxu3 %v594_v26  ;;  %v570_v50 = vld [vmem:[%s1625_s28 + $0x6b8] sm:$0xff] }
  0xc8   : > { %855 = vmatpush.msrb.mxu0 %v402_v27  ;;  %875 = vmatpush.msrb.mxu1 %v466_v28  ;;  %v378_v51 = vld [vmem:[%s1625_s28 + $0xb8] sm:$0xff]  ;;  %v949_v28 = vperm.slane %v946_v14, 1 }
  0xc9   : > { %897 = vmatpush.msrb.mxu2 %v522_v29  ;;  %916 = vmatpush.msrb.mxu3 %v590_v30  ;;  %v442_v52 = vld [vmem:[%s1625_s28 + $0x2b8] sm:$0xff]  ;;  %v963_v30 = vperm.slane %v960_v16, 1 }
  0xca   : > { %856 = vmatpush.msrb.mxu0 %v398_v31  ;;  %876 = vmatpush.msrb.mxu1 %v462_v32  ;;  %v498_v53 = vld [vmem:[%s1625_s28 + $0x478] sm:$0xff] }
  0xcb   : > { %898 = vmatpush.msrb.mxu2 %v518_v33  ;;  %917 = vmatpush.msrb.mxu3 %v586_v34  ;;  %v566_v54 = vld [vmem:[%s1625_s28 + $0x698] sm:$0xff] }
  0xcc   : > { %857 = vmatpush.msrb.mxu0 %v394_v35  ;;  %877 = vmatpush.msrb.mxu1 %v458_v36  ;;  %v374_v55 = vld [vmem:[%s1625_s28 + $0x98] sm:$0xff] }
  0xcd   : > { %899 = vmatpush.msrb.mxu2 %v514_v37  ;;  %918 = vmatpush.msrb.mxu3 %v582_v38  ;;  %v438_v56 = vld [vmem:[%s1625_s28 + $0x298] sm:$0xff] }
  0xce   : > { %858 = vmatpush.msrb.mxu0 %v390_v39  ;;  %878 = vmatpush.msrb.mxu1 %v454_v40  ;;  %v494_v57 = vld [vmem:[%s1625_s28 + $0x458] sm:$0xff]  ;;  %v950_v40 = vperm.slane %v946_v14, 2 }
  0xcf   : > { %900 = vmatpush.msrb.mxu2 %v510_v41  ;;  %919 = vmatpush.msrb.mxu3 %v578_v42  ;;  %v562_v58 = vld [vmem:[%s1625_s28 + $0x678] sm:$0xff]  ;;  %v964_v42 = vperm.slane %v960_v16, 2 }
  0xd0   : > { %859 = vmatpush.msrb.mxu0 %v386_v43  ;;  %879 = vmatpush.msrb.mxu1 %v450_v44  ;;  %v370_v59 = vld [vmem:[%s1625_s28 + $0x78] sm:$0xff] }
  0xd1   : > { %901 = vmatpush.msrb.mxu2 %v506_v45  ;;  %920 = vmatpush.msrb.mxu3 %v574_v46  ;;  %v434_v61 = vld [vmem:[%s1625_s28 + $0x278] sm:$0xff] }
  0xd2   : > { %860 = vmatpush.msrb.mxu0 %v382_v47  ;;  %880 = vmatpush.msrb.mxu1 %v446_v48  ;;  %v490_v62 = vld [vmem:[%s1625_s28 + $0x438] sm:$0xff] }
  0xd3   : > { %902 = vmatpush.msrb.mxu2 %v502_v49  ;;  %921 = vmatpush.msrb.mxu3 %v570_v50  ;;  %v558_v63 = vld [vmem:[%s1625_s28 + $0x658] sm:$0xff] }
  0xd4   : > { %827 = vmatmul.f32.vlgmr.msra.gmra.mxu2 %v1765_v60  ;;  %861 = vmatpush.msrb.mxu0 %v378_v51  ;;  %v366_v1 = vld [vmem:[%s1625_s28 + $0x58] sm:$0xff]  ;;  %v951_v51 = vperm.slane %v946_v14, 3 }
  0xd5   : > { %881 = vmatpush.msrb.mxu1 %v442_v52  ;;  %903 = vmatpush.msrb.mxu2 %v498_v53  ;;  %v430_v2 = vld [vmem:[%s1625_s28 + $0x258] sm:$0xff] }
  0xd6   : > { %922 = vmatpush.msrb.mxu3 %v566_v54  ;;  %862 = vmatpush.msrb.mxu0 %v374_v55  ;;  %v486_v3 = vld [vmem:[%s1625_s28 + $0x418] sm:$0xff]  ;;  %v965_v54 = vperm.slane %v960_v16, 3 }
  0xd7   : > { %847 = vmatmul.f32.vlgmr.msra.gmra.mxu3 %v1770_v0  ;;  %882 = vmatpush.msrb.mxu1 %v438_v56  ;;  %v554_v4 = vld [vmem:[%s1625_s28 + $0x638] sm:$0xff] }
  0xd8   : > { %904 = vmatpush.msrb.mxu2 %v494_v57  ;;  %923 = vmatpush.msrb.mxu3 %v562_v58  ;;  %v362_v7 = vld [vmem:[%s1625_s28 + $0x38] sm:$0xff] }
  0xd9   : > { %787 = vmatmul.f32.vlgmr.msra.gmra.mxu0 %v1777_v5  ;;  %807 = vmatmul.f32.vlgmr.msra.gmra.mxu1 %v1780_v6  ;;  %v426_v8 = vld [vmem:[%s1625_s28 + $0x238] sm:$0xff] }
  0xda   : > { %863 = vmatpush.msrb.mxu0 %v370_v59  ;;  %883 = vmatpush.msrb.mxu1 %v434_v61  ;;  %v550_v9 = vld [vmem:[%s1625_s28 + $0x618] sm:$0xff] }
  0xdb   : > { %905 = vmatpush.msrb.mxu2 %v490_v62  ;;  %924 = vmatpush.msrb.mxu3 %v558_v63  ;;  %v358_v10 = vld [vmem:[%s1625_s28 + $0x18] sm:$0xff] }
  0xdc   : > { %864 = vmatpush.msrb.mxu0 %v366_v1  ;;  %884 = vmatpush.msrb.mxu1 %v430_v2  ;;  %v422_v11 = vld [vmem:[%s1625_s28 + $0x218] sm:$0xff] }
  0xdd   : > { %906 = vmatpush.msrb.mxu2 %v486_v3  ;;  %925 = vmatpush.msrb.mxu3 %v554_v4 }
  0xde   : > { %907 = vmatmul.f32.vlgmr.msrb.gmra.mxu2 %v1765_v60  ;;  %865 = vmatpush.msrb.mxu0 %v362_v7 }
  0xdf   : > { %885 = vmatpush.msrb.mxu1 %v426_v8  ;;  %926 = vmatpush.msrb.mxu3 %v550_v9 }
  0xe0   : > { %927 = vmatmul.f32.vlgmr.msrb.gmra.mxu3 %v1770_v0  ;;  %866 = vmatpush.msrb.mxu0 %v358_v10 }
  0xe1   : > { %886 = vmatpush.msrb.mxu1 %v422_v11  ;;  %867 = vmatmul.f32.vlgmr.msrb.gmra.mxu0 %v1777_v5 }
  0xe2   : > { %887 = vmatmul.f32.vlgmr.msrb.gmra.mxu1 %v1780_v6 }
  0xfc   : > { %v668_v60 = vpop.f32.mrf.mxu2 }
 0x11a   : > { %v628_v12 = vpop.f32.mrf.mxu0  ;;  %v648_v13 = vpop.f32.mrf.mxu1 }
 0x11b   : > { %v649_v15 = vadd.f32 %v648_v13, %v628_v12 }
 0x11d   : > { %v669_v17 = vadd.f32 %v668_v60, %v649_v15  ;;  %v688_v18 = vpop.f32.mrf.mxu3 }
 0x11f   : > { %v689_v20 = vadd.f32 %v688_v18, %v669_v17 }
 0x121   : > { %v956_v0 = vmul.f32 %v948_v19, %v689_v20 }
 0x123   : > { %v970_v22 = vadd.f32 %v962_v21, %v956_v0 }
 0x125   : > { %v974_v23 = vmax.f32 %v970_v22, 0.0 }
 0x127   : > { %978 = vst [vmem:[%s1924_s24] sm:$0xff] %v974_v23 }
 0x13c   : > { %v708_v5 = vpop.f32.mrf.mxu0  ;;  %v728_v6 = vpop.f32.mrf.mxu1 }
 0x13d   : > { %v748_v24 = vpop.f32.mrf.mxu2  ;;  %v729_v25 = vadd.f32 %v728_v6, %v708_v5 }
 0x13f   : > { %v749_v26 = vadd.f32 %v748_v24, %v729_v25 }
 0x140   : > { %v768_v27 = vpop.f32.mrf.mxu3 }
 0x141   : > { %v769_v29 = vadd.f32 %v768_v27, %v749_v26 }
 0x143   : > { %v957_v31 = vmul.f32 %v949_v28, %v769_v29 }
 0x145   : > { %v971_v32 = vadd.f32 %v963_v30, %v957_v31 }
 0x147   : > { %v975_v33 = vmax.f32 %v971_v32, 0.0 }
 0x149   : > { %979 = vst [vmem:[%s1924_s24 + $0x8] sm:$0xff] %v975_v33 }
 0x156   : > { %v788_v34 = vpop.f32.mrf.mxu0  ;;  %v808_v35 = vpop.f32.mrf.mxu1 }
 0x157   : > { %v828_v36 = vpop.f32.mrf.mxu2  ;;  %v809_v37 = vadd.f32 %v808_v35, %v788_v34 }
 0x159   : > { %v829_v38 = vadd.f32 %v828_v36, %v809_v37 }
 0x15a   : > { %v848_v39 = vpop.f32.mrf.mxu3 }
 0x15b   : > { %v849_v41 = vadd.f32 %v848_v39, %v829_v38 }
 0x15d   : > { %v958_v43 = vmul.f32 %v950_v40, %v849_v41 }
 0x15e   : > { %v868_v44 = vpop.f32.mrf.mxu0 }
 0x15f   : > { %v972_v45 = vadd.f32 %v964_v42, %v958_v43  ;;  %v888_v46 = vpop.f32.mrf.mxu1 }
 0x160   : > { %v889_v47 = vadd.f32 %v888_v46, %v868_v44 }
 0x161   : > { %v908_v48 = vpop.f32.mrf.mxu2  ;;  %v976_v49 = vmax.f32 %v972_v45, 0.0 }
 0x162   : > { %v909_v50 = vadd.f32 %v908_v48, %v889_v47 }
 0x163   : > { %980 = vst [vmem:[%s1924_s24 + $0x10] sm:$0xff] %v976_v49  ;;  %v928_v52 = vpop.f32.mrf.mxu3 }
 0x164   : > { %v929_v53 = vadd.f32 %v928_v52, %v909_v50 }
 0x166   : > { %v959_v55 = vmul.f32 %v951_v51, %v929_v53 }
 0x168   : > { %v973_v56 = vadd.f32 %v965_v54, %v959_v55 }
 0x16a   : > { %v977_v57 = vmax.f32 %v973_v56, 0.0 }
 0x16c   : > { %981 = vst [vmem:[%s1924_s24 + $0x18] sm:$0xff] %v977_v57 }
 0x16d   : > { %1395 = shalt.err (!%p1392_p13)
}
 0x16e   : > { %1172 = dma.vmem_to_hbm [thread:$0]  (%p1580_p0), %s997_s12, 512, %s999_s14, %s983_s18  }
 0x16f PF: > { %s1010_s1 = sand.u32 1, %s1438_s15   ;;  %p1189_p4 = pnand %p1141_p3, %p1584_p2 }
 0x170   : > { %s1011_s26 = scalar_lea.sflag [#allocation5], %s1010_s1 }
 0x171   : > { %p1190_p5 = pneg %p1189_p4 }
 0x173   : > { %1433 = dma.done.wait (%p1190_p5), %s1011_s26, 512  }
 0x174   : > { %1435 = vsyncadd (%p1190_p5), %s1011_s26, 4294966784  ;;  %s24_s20 = sadd.s32 1, %s1458_s20   ;;  %s1991_s28 = sld [smem:[#allocation16_spill]] }
 0x175   : > { %p21_p1 = scmp.ge.s32.totalorder %s24_s20, 4   ;;  %s1992_s17 = sld [smem:[#allocation19_spill]] }
 0x176   : > { %s1993_s18 = sld [smem:[#allocation17_spill]]  ;;  %s1995_s15 = smov %s1442_s16 }
 0x177   : > { %s1994_s19 = sld [smem:[#allocation18_spill]]  ;;  %23 = sbr.rel (!%p21_p1) target bundleno = 12 (0xc), region = 119 }
 0x17a   : > { %s1996_s16 = smov %s1991_s28 }
 0x17c   :  { %1017 = vsyncpa [#allocation4], 1 }
 0x17d   :  { %1019 = vsyncpa [#allocation4 + $0x1], 1 }
 0x17e   :  { %1020 = vsyncpa [#allocation7], 1 }
 0x17f   :  { %1022 = vsyncpa [#allocation7 + $0x1], 1 }
 0x180   :  { %1023 = vsyncpa [#allocation10], 1 }
 0x181   :  { %1025 = vsyncpa [#allocation10 + $0x1], 1 }
 0x182   :  { %1026 = vsyncpa [#allocation5], 1 }
 0x183   :  { %1028 = vsyncpa [#allocation5 + $0x1], 1 }

</bundles_post_ra>
